<compile_context>
chip_gen: v5e
topology: v5e:2x2
jax: 0.10.0
libtpu: 0.0.40
codegen_flags: <defaults>
</compile_context>

<pallas_src>
import functools

import jax
import jax.numpy as jnp
from jax import lax
from jax.experimental import pallas as pl
from jax.experimental.pallas import tpu as pltpu

_SEG_CHUNK = 2048                 # lanes computed per inner-loop step
_SEG_SINGLE_BLOCK = 16 * 1024     # below this many pixels: one block == one chunk
_SEG_STEP_BYTES = 3 * 1024 * 1024  # target fresh HBM bytes per seg grid step
_SEG_MAX_LANES = 128 * 1024       # hard cap on lanes DMA'd per seg grid step
_BCE_STEP_BYTES = 2 * 1024 * 1024  # target fresh HBM bytes per bce grid step


def _round_down(x, m):
    return (x // m) * m


@functools.lru_cache(maxsize=None)
def _vmem_limit_bytes():
    # v5e/v6e have 128 MiB physical VMEM, v7x only 64 MiB per TensorCore.
    # Size the scoped limit per generation; fall back to a value that is safe
    # on every known generation (our working set is ~20 MiB anyway).
    try:
        cap = int(pltpu.get_tpu_info().vmem_capacity_bytes)
        return int(max(32 * 1024 * 1024, min(0.75 * cap, 96 * 1024 * 1024)))
    except Exception:
        return 48 * 1024 * 1024


def _seg_tiles(hw, bytes_per_px):
    """Returns (block lanes, chunk lanes) for the fused CE+dice kernel."""
    if hw <= _SEG_SINGLE_BLOCK:
        return hw, hw                       # one full block, one chunk
    cap = max(_SEG_CHUNK,
              (_SEG_STEP_BYTES // max(bytes_per_px, 1)) // _SEG_CHUNK * _SEG_CHUNK)
    cap = min(cap, _SEG_MAX_LANES)
    tp = min(cap, _round_down(hw, _SEG_CHUNK))   # multiple of chunk, <= hw
    return tp, _SEG_CHUNK


# ----------------------------------------------------------------------------
# Fused cross-entropy (log_softmax + NLL with ignore_index) + dice partial sums
# ----------------------------------------------------------------------------
def _ce_dice_kernel(logits_ref, targets_ref, out_ref, acc_ref, *,
                    ignore_index, hw, chunk):
    pi = pl.program_id(1)

    @pl.when(pi == 0)
    def _():
        acc_ref[...] = jnp.zeros_like(acc_ref)

    c = logits_ref.shape[1]
    tp = logits_ref.shape[2]
    nck = tp // chunk

    lane = jax.lax.broadcasted_iota(jnp.int32, (1, chunk), 1)
    cls = jax.lax.broadcasted_iota(jnp.int32, (c, chunk), 0)

    def chunk_body(off):
        x = logits_ref[0, :, pl.ds(off, chunk)].astype(jnp.float32)   # (C, CK)
        t = targets_ref[0, :, pl.ds(off, chunk)].astype(jnp.int32)    # (1, CK)

        # Lanes past H*W (ragged tail of the last block) are masked everywhere.
        in_bounds = (pi * tp + off) + lane < hw                        # (1, CK)

        # --- cross entropy: log-softmax over the class (sublane) axis --------
        m = jnp.max(x, axis=0, keepdims=True)
        lse = m + jnp.log(jnp.sum(jnp.exp(x - m), axis=0, keepdims=True))
        x_t = jnp.sum(jnp.where(cls == t, x, 0.0), axis=0, keepdims=True)

        valid = jnp.logical_and(t != ignore_index, in_bounds)
        # NOTE: targets outside [0, C) that are not ignore_index contribute
        # lse (PyTorch CrossEntropyLoss would raise instead).
        loss_p = jnp.where(valid, lse - x_t, 0.0)       # -log p[target]
        cnt_p = valid.astype(jnp.float32)               # weight=None specialization

        # --- dice partial sums (fused: one HBM pass over segin/segmask) ------
        # preds = (softmax class-1 > class-0) == (logit-1 > logit-0).
        ibf = in_bounds.astype(jnp.float32)
        pred = (x[1:2, :] > x[0:1, :]).astype(jnp.float32) * ibf
        # Raw target values (incl. ignore_index) on purpose: parity with the
        # PyTorch DiceLoss.dice_coeff, which does not mask 255s.
        tf = t.astype(jnp.float32) * ibf

        acc_ref[...] += jnp.concatenate(
            [loss_p, cnt_p, pred * tf, pred, tf], axis=0)              # (5, CK)

    if nck == 1:
        chunk_body(0)
    else:
        def body(ci, carry):
            chunk_body(pl.multiple_of(ci * chunk, 128))
            return carry
        lax.fori_loop(0, nck, body, 0)

    @pl.when(pi == pl.num_programs(1) - 1)
    def _():
        sums = jnp.sum(acc_ref[...], axis=1, keepdims=True)            # (5, 1)
        out_ref[0] = jnp.broadcast_to(sums, (5, 128))


def _seg_ce_and_dice(segin, segmask, *, ignore_index=255, epsilon=1e-6):
    """Returns (cross_entropy_loss, dice_loss) for (N,C,H,W) logits, (N,H,W) labels."""
    n, c, h, w = segin.shape
    hw = h * w

    x = segin.reshape(n, c, hw)          # NCHW-native, zero-copy, lane-dense
    t = segmask.reshape(n, 1, hw)        # native integer dtype; cast in-kernel

    bytes_per_px = c * segin.dtype.itemsize + t.dtype.itemsize
    tp, ck = _seg_tiles(hw, bytes_per_px)
    n_pt = pl.cdiv(hw, tp)

    out = pl.pallas_call(
        functools.partial(_ce_dice_kernel, ignore_index=ignore_index, hw=hw,
                          chunk=ck),
        out_shape=jax.ShapeDtypeStruct((n, 5, 128), jnp.float32),
        grid_spec=pltpu.PrefetchScalarGridSpec(
            num_scalar_prefetch=0,
            grid=(n, n_pt),
            in_specs=[
                pl.BlockSpec((1, c, tp), lambda ni, pi: (ni, 0, pi)),  # logits
                pl.BlockSpec((1, 1, tp), lambda ni, pi: (ni, 0, pi)),  # targets
            ],
            out_specs=pl.BlockSpec((1, 5, 128), lambda ni, pi: (ni, 0, 0)),
            scratch_shapes=[pltpu.VMEM((5, ck), jnp.float32)],
        ),
        compiler_params=pltpu.CompilerParams(
            dimension_semantics=("parallel", "arbitrary"),
            vmem_limit_bytes=_vmem_limit_bytes()),
    )(x, t)

    sums = out[:, :, 0]                                   # (n, 5)

    # Cross entropy (size_average=True, weight=None): mean over non-ignored
    # pixels.  (If every pixel is ignore_index this is 0/0 = NaN, matching
    # PyTorch.)
    ce = jnp.sum(sums[:, 0]) / jnp.sum(sums[:, 1])

    # Dice (DiceLoss.dice_coeff semantics: per-image sums, raw target values).
    inter = 2.0 * sums[:, 2]
    sets = sums[:, 3] + sums[:, 4]
    sets = jnp.where(sets == 0, inter, sets)
    dice = jnp.mean((inter + epsilon) / (sets + epsilon))
    return ce, 1.0 - dice


# ----------------------------------------------------------------------------
# Class-balanced BCE-with-logits over the edge map (bce2d)
# ----------------------------------------------------------------------------
def _bce2d_kernel(x_ref, t_ref, acc_ref, *, n_rows):
    ri = pl.program_id(0)

    @pl.when(ri == 0)
    def _():
        acc_ref[...] = jnp.zeros_like(acc_ref)

    x = x_ref[...].astype(jnp.float32)          # (TR, W)  sublane-dense tile
    t = t_ref[...].astype(jnp.int32)
    tr, w = x.shape

    row = jax.lax.broadcasted_iota(jnp.int32, (tr, w), 0)
    in_bounds = ri * tr + row < n_rows
    pos = jnp.logical_and(t == 1, in_bounds)
    neg = jnp.logical_and(t == 0, in_bounds)
    # (t > 1 pixels are "ignore": excluded from both sums and counts.)

    # Stable BCE-with-logits; the log1p(exp(-|x|)) term is shared.
    softplus = jnp.log1p(jnp.exp(-jnp.abs(x)))
    bce_pos = jnp.maximum(-x, 0.0) + softplus   # target == 1
    bce_neg = jnp.maximum(x, 0.0) + softplus    # target == 0

    upd = jnp.concatenate([
        jnp.sum(jnp.where(pos, bce_pos, 0.0), axis=0, keepdims=True),  # sum bce | pos
        jnp.sum(jnp.where(neg, bce_neg, 0.0), axis=0, keepdims=True),  # sum bce | neg
        jnp.sum(pos.astype(jnp.float32), axis=0, keepdims=True),       # pos_num
        jnp.sum(neg.astype(jnp.float32), axis=0, keepdims=True),       # neg_num
    ], axis=0)                                  # (4, W)
    acc_ref[...] += upd


def _bce2d(edgein, edgemask):
    # TODO(synk): the edge kernel runs on a single TensorCore on v7x; it is a
    # small fraction of total HBM traffic compared to the fused seg kernel.
    shape = edgein.shape
    w = shape[-1]
    n_rows = 1
    for d in shape[:-1]:
        n_rows *= d
    total = n_rows * w

    x = edgein.reshape(n_rows, w)
    t = edgemask.reshape(n_rows, w)             # native integer dtype

    bytes_per_row = w * (x.dtype.itemsize + t.dtype.itemsize)
    tr = max(8, (_BCE_STEP_BYTES // max(bytes_per_row, 1)) // 8 * 8)
    tr = min(tr, 8192)
    if n_rows <= tr:
        tr = n_rows
    n_rt = pl.cdiv(n_rows, tr)

    acc = pl.pallas_call(
        functools.partial(_bce2d_kernel, n_rows=n_rows),
        out_shape=jax.ShapeDtypeStruct((4, w), jnp.float32),
        grid_spec=pltpu.PrefetchScalarGridSpec(
            num_scalar_prefetch=0,
            grid=(n_rt,),
            in_specs=[pl.BlockSpec((tr, w), lambda i: (i, 0)),
                      pl.BlockSpec((tr, w), lambda i: (i, 0))],
            out_specs=pl.BlockSpec((4, w), lambda i: (0, 0)),
        ),
        compiler_params=pltpu.CompilerParams(
            dimension_semantics=("arbitrary",),
            vmem_limit_bytes=_vmem_limit_bytes()),
    )(x, t)

    sums = jnp.sum(acc, axis=1)                 # (4,)
    bce_pos, bce_neg = sums[0], sums[1]
    pos_num, neg_num = sums[2], sums[3]
    sum_num = pos_num + neg_num
    # weight[pos]=neg/sum, weight[neg]=pos/sum, weight[ignore]=0; mean over ALL
    # pixels (F.binary_cross_entropy_with_logits, size_average=True).  NaN if
    # every pixel is "ignore", matching the PyTorch code.
    return (neg_num * bce_pos + pos_num * bce_neg) / sum_num / total


# ----------------------------------------------------------------------------
# SegEdgeSegLoss.forward
# ----------------------------------------------------------------------------
def seg_edge_seg_loss(inputs, targets, *, ignore_index=255, dice=True,
                      normalise=False, seg_ce_weight=5.0, edge_weight=10.0,
                      threshold=0.8):
    segin, edgein = inputs
    segmask, edgemask = targets

    # NOTE: CrossEntropyLoss2d class weights are specialized to None at trace
    # time (SegEdgeSegLoss never constructs it with weights).
    ce, dice_l = _seg_ce_and_dice(segin, segmask, ignore_index=ignore_index)
    losses = {
        "seg_loss": seg_ce_weight * ce,
        "edge_loss": edge_weight * _bce2d(edgein, edgemask),
    }
    if dice:
        losses["dice_loss"] = dice_l
    # TODO(synk): normalise=True branch (edge_attention + DualTaskLoss) is not
    # implemented -- DualTaskLoss is not defined in the reference source.
    return losses


# ----------------------------------------------------------------------------
# Pure-JAX references
# ----------------------------------------------------------------------------
def _ce_reference(logits, targets, ignore_index=255):
    logp = jax.nn.log_softmax(logits.astype(jnp.float32), axis=1)
    t = targets.astype(jnp.int32)
    valid = t != ignore_index
    t_safe = jnp.where(valid, t, 0)
    g = jnp.take_along_axis(logp, t_safe[:, None, :, :], axis=1)[:, 0]
    num = jnp.sum(jnp.where(valid, -g, 0.0))
    den = jnp.sum(valid.astype(jnp.float32))
    return num / den


def _bce2d_reference(x, t):
    xf = x.reshape(-1).astype(jnp.float32)
    ti = t.reshape(-1).astype(jnp.int32)
    pos = ti == 1
    neg = ti == 0
    pos_num = jnp.sum(pos.astype(jnp.float32))
    neg_num = jnp.sum(neg.astype(jnp.float32))
    sum_num = pos_num + neg_num
    wgt = jnp.where(pos, neg_num / sum_num, jnp.where(neg, pos_num / sum_num, 0.0))
    tf = ti.astype(jnp.float32)
    bce = jnp.maximum(xf, 0.0) - xf * tf + jnp.log1p(jnp.exp(-jnp.abs(xf)))
    return jnp.mean(wgt * bce)


def _dice_reference(segin, segmask, eps=1e-6):
    pred = (segin[:, 1] > segin[:, 0]).astype(jnp.float32)   # softmax-monotone
    tgt = segmask.astype(jnp.float32)
    inter = 2.0 * jnp.sum(pred * tgt, axis=(1, 2))
    sets = jnp.sum(pred, axis=(1, 2)) + jnp.sum(tgt, axis=(1, 2))
    sets = jnp.where(sets == 0, inter, sets)
    dice = jnp.mean((inter + eps) / (sets + eps))
    return 1.0 - dice


if __name__ == "__main__":
    key = jax.random.PRNGKey(0)
    k1, k2, k3, k4, k5 = jax.random.split(key, 5)

    N, C, H, W = 2, 4, 16, 16
    segin = jax.random.normal(k1, (N, C, H, W), dtype=jnp.float32)
    segmask = jax.random.randint(k2, (N, H, W), 0, C, dtype=jnp.int32)
    segmask = jnp.where(jax.random.bernoulli(k3, 0.1, (N, H, W)), 255, segmask)

    edgein = jax.random.normal(k4, (N, 1, H, W), dtype=jnp.float32)
    edgemask = jax.random.randint(k5, (N, 1, H, W), 0, 2, dtype=jnp.int32)
    edgemask = edgemask.at[0, 0, 0, :4].set(2)   # a few ignored edge pixels

    losses = jax.block_until_ready(
        seg_edge_seg_loss((segin, edgein), (segmask, edgemask)))

    ref_seg = 5.0 * _ce_reference(segin, segmask)
    ref_edge = 10.0 * _bce2d_reference(edgein, edgemask)
    ref_dice = _dice_reference(segin, segmask)

    assert jnp.allclose(losses["seg_loss"], ref_seg, rtol=1e-5, atol=1e-5), (
        losses["seg_loss"], ref_seg)
    assert jnp.allclose(losses["edge_loss"], ref_edge, rtol=1e-5, atol=1e-5), (
        losses["edge_loss"], ref_edge)
    assert jnp.allclose(losses["dice_loss"], ref_dice, rtol=1e-5, atol=1e-5), (
        losses["dice_loss"], ref_dice)

    print("KERNEL_OK")
</pallas_src>

<mosaic_0001>
module attributes {stable_mosaic.version = 11 : i64} {
  func.func @_ce_dice_kernel(%arg0: i32, %arg1: i32, %arg2: memref<1x4x256xf32, #tpu.memory_space<vmem>>, %arg3: memref<1x1x256xi32, #tpu.memory_space<vmem>>, %arg4: memref<1x5x128xf32, #tpu.memory_space<vmem>>, %arg5: memref<5x256xf32, #tpu.memory_space<vmem>>) attributes {dimension_semantics = [#tpu.dimension_semantics<parallel>, #tpu.dimension_semantics<arbitrary>], iteration_bounds = array<i64: 2, 1>, scalar_prefetch = 0 : i64, scratch_operands = 1 : i64, tpu.core_type = #tpu.core_type<tc>, window_params = [{transform_indices = @transform_0, window_bounds = array<i64: 1, 4, 256>}, {transform_indices = @transform_1, window_bounds = array<i64: 1, 1, 256>}, {transform_indices = @transform_2, window_bounds = array<i64: 1, 5, 128>}]} {
    %c0_i32 = arith.constant 0 : i32
    %0 = arith.cmpi eq, %arg1, %c0_i32 : i32
    %1 = arith.extui %0 : i1 to i32
    %c0_i32_0 = arith.constant 0 : i32
    %2 = arith.cmpi ne, %1, %c0_i32_0 : i32
    scf.if %2 {
      %cst_18 = arith.constant 0.000000e+00 : f32
      %56 = vector.broadcast %cst_18 : f32 to vector<5x256xf32>
      %c0_19 = arith.constant 0 : index
      %c0_20 = arith.constant 0 : index
      %57 = vector.load %arg5[%c0_19, %c0_20] : memref<5x256xf32, #tpu.memory_space<vmem>>, vector<5x256xf32>
      tpu.vector_store %arg5[%c0_19, %c0_20], %56 {strides = array<i32>} : memref<5x256xf32, #tpu.memory_space<vmem>>, vector<5x256xf32>,
    } else {
    }
    %3 = tpu.iota {dimensions = array<i32: 1>} : vector<1x256xi32>
    %4 = tpu.iota {dimensions = array<i32: 0>} : vector<4x256xi32>
    %c0 = arith.constant 0 : index
    %c0_1 = arith.constant 0 : index
    %c0_2 = arith.constant 0 : index
    %5 = vector.load %arg2[%c0, %c0_1, %c0_2] : memref<1x4x256xf32, #tpu.memory_space<vmem>>, vector<1x4x256xf32>
    %6 = vector.shape_cast %5 : vector<1x4x256xf32> to vector<4x256xf32>
    %c0_3 = arith.constant 0 : index
    %c0_4 = arith.constant 0 : index
    %c0_5 = arith.constant 0 : index
    %7 = vector.load %arg3[%c0_3, %c0_4, %c0_5] : memref<1x1x256xi32, #tpu.memory_space<vmem>>, vector<1x1x256xi32>
    %8 = vector.shape_cast %7 : vector<1x1x256xi32> to vector<1x256xi32>
    %c256_i32 = arith.constant 256 : i32
    %9 = arith.muli %arg1, %c256_i32 : i32
    %c0_i32_6 = arith.constant 0 : i32
    %10 = arith.addi %9, %c0_i32_6 : i32
    %11 = vector.broadcast %10 : i32 to vector<1x256xi32>
    %12 = arith.addi %11, %3 : vector<1x256xi32>
    %c256_i32_7 = arith.constant 256 : i32
    %13 = vector.broadcast %c256_i32_7 : i32 to vector<1x256xi32>
    %14 = arith.cmpi slt, %12, %13 : vector<1x256xi32>
    %cst = arith.constant dense<0xFF800000> : vector<256xf32>
    %15 = vector.multi_reduction <maximumf>, %6, %cst [0] : vector<4x256xf32> to vector<256xf32>
    %16 = vector.shape_cast %15 : vector<256xf32> to vector<1x256xf32>
    %17 = vector.broadcast %16 : vector<1x256xf32> to vector<4x256xf32>
    %18 = arith.subf %6, %17 : vector<4x256xf32>
    %19 = math.exp %18 : vector<4x256xf32>
    %cst_8 = arith.constant dense<0.000000e+00> : vector<256xf32>
    %20 = vector.multi_reduction <add>, %19, %cst_8 [0] : vector<4x256xf32> to vector<256xf32>
    %21 = vector.shape_cast %20 : vector<256xf32> to vector<1x256xf32>
    %22 = math.log %21 : vector<1x256xf32>
    %23 = arith.addf %16, %22 : vector<1x256xf32>
    %24 = vector.broadcast %8 : vector<1x256xi32> to vector<4x256xi32>
    %25 = arith.cmpi eq, %4, %24 : vector<4x256xi32>
    %cst_9 = arith.constant 0.000000e+00 : f32
    %26 = vector.broadcast %cst_9 : f32 to vector<4x256xf32>
    %27 = arith.select %25, %6, %26 : vector<4x256xi1>, vector<4x256xf32>
    %cst_10 = arith.constant dense<0.000000e+00> : vector<256xf32>
    %28 = vector.multi_reduction <add>, %27, %cst_10 [0] : vector<4x256xf32> to vector<256xf32>
    %29 = vector.shape_cast %28 : vector<256xf32> to vector<1x256xf32>
    %c255_i32 = arith.constant 255 : i32
    %30 = vector.broadcast %c255_i32 : i32 to vector<1x256xi32>
    %31 = arith.cmpi ne, %8, %30 : vector<1x256xi32>
    %32 = arith.andi %31, %14 : vector<1x256xi1>
    %33 = arith.subf %23, %29 : vector<1x256xf32>
    %cst_11 = arith.constant 0.000000e+00 : f32
    %34 = vector.broadcast %cst_11 : f32 to vector<1x256xf32>
    %35 = arith.select %32, %33, %34 : vector<1x256xi1>, vector<1x256xf32>
    %36 = arith.extui %32 : vector<1x256xi1> to vector<1x256xi32>
    %37 = arith.sitofp %36 : vector<1x256xi32> to vector<1x256xf32>
    %38 = arith.extui %14 : vector<1x256xi1> to vector<1x256xi32>
    %39 = arith.sitofp %38 : vector<1x256xi32> to vector<1x256xf32>
    %40 = vector.extract_strided_slice %6 {offsets = [1, 0], sizes = [1, 256], strides = [1, 1]} : vector<4x256xf32> to vector<1x256xf32>
    %41 = vector.extract_strided_slice %6 {offsets = [0, 0], sizes = [1, 256], strides = [1, 1]} : vector<4x256xf32> to vector<1x256xf32>
    %42 = arith.cmpf ogt, %40, %41 : vector<1x256xf32>
    %43 = arith.extui %42 : vector<1x256xi1> to vector<1x256xi32>
    %44 = arith.sitofp %43 : vector<1x256xi32> to vector<1x256xf32>
    %45 = arith.mulf %44, %39 : vector<1x256xf32>
    %46 = arith.sitofp %8 : vector<1x256xi32> to vector<1x256xf32>
    %47 = arith.mulf %46, %39 : vector<1x256xf32>
    %c0_12 = arith.constant 0 : index
    %c0_13 = arith.constant 0 : index
    %48 = vector.load %arg5[%c0_12, %c0_13] : memref<5x256xf32, #tpu.memory_space<vmem>>, vector<5x256xf32>
    %49 = arith.mulf %45, %47 : vector<1x256xf32>
    %50 = tpu.concatenate %35, %37, %49, %45, %47 in 0 : vector<1x256xf32>, vector<1x256xf32>, vector<1x256xf32>, vector<1x256xf32>, vector<1x256xf32> -> vector<5x256xf32>
    %51 = arith.addf %48, %50 : vector<5x256xf32>
    %c0_14 = arith.constant 0 : index
    %c0_15 = arith.constant 0 : index
    %52 = vector.load %arg5[%c0_14, %c0_15] : memref<5x256xf32, #tpu.memory_space<vmem>>, vector<5x256xf32>
    tpu.vector_store %arg5[%c0_14, %c0_15], %51 {strides = array<i32>} : memref<5x256xf32, #tpu.memory_space<vmem>>, vector<5x256xf32>,
    %c0_i32_16 = arith.constant 0 : i32
    %53 = arith.cmpi eq, %arg1, %c0_i32_16 : i32
    %54 = arith.extui %53 : i1 to i32
    %c0_i32_17 = arith.constant 0 : i32
    %55 = arith.cmpi ne, %54, %c0_i32_17 : i32
    scf.if %55 {
      %c0_18 = arith.constant 0 : index
      %c0_19 = arith.constant 0 : index
      %56 = vector.load %arg5[%c0_18, %c0_19] : memref<5x256xf32, #tpu.memory_space<vmem>>, vector<5x256xf32>
      %cst_20 = arith.constant dense<0.000000e+00> : vector<5xf32>
      %57 = vector.multi_reduction <add>, %56, %cst_20 [1] : vector<5x256xf32> to vector<5xf32>
      %58 = vector.shape_cast %57 : vector<5xf32> to vector<5x1xf32>
      %59 = vector.shape_cast %58 : vector<5x1xf32> to vector<5x1xf32>
      %60 = vector.broadcast %59 : vector<5x1xf32> to vector<5x128xf32>
      %c0_21 = arith.constant 0 : index
      %c0_22 = arith.constant 0 : index
      %c0_23 = arith.constant 0 : index
      %61 = vector.load %arg4[%c0_21, %c0_22, %c0_23] : memref<1x5x128xf32, #tpu.memory_space<vmem>>, vector<1x5x128xf32>
      %62 = vector.shape_cast %61 : vector<1x5x128xf32> to vector<5x128xf32>
      %63 = vector.shape_cast %60 : vector<5x128xf32> to vector<1x5x128xf32>
      tpu.vector_store %arg4[%c0_21, %c0_22, %c0_23], %63 {strides = array<i32>} : memref<1x5x128xf32, #tpu.memory_space<vmem>>, vector<1x5x128xf32>,
    } else {
    }
    return
  }
  func.func @transform_0(%arg0: i32, %arg1: i32) -> (i32, i32, i32) {
    %c0_i32 = arith.constant 0 : i32
    %c0_i32_0 = arith.constant 0 : i32
    return %arg0, %c0_i32, %arg1 : i32, i32, i32
  }
  func.func @transform_1(%arg0: i32, %arg1: i32) -> (i32, i32, i32) {
    %c0_i32 = arith.constant 0 : i32
    %c0_i32_0 = arith.constant 0 : i32
    return %arg0, %c0_i32, %arg1 : i32, i32, i32
  }
  func.func @transform_2(%arg0: i32, %arg1: i32) -> (i32, i32, i32) {
    %c0_i32 = arith.constant 0 : i32
    %c0_i32_0 = arith.constant 0 : i32
    %c0_i32_1 = arith.constant 0 : i32
    return %arg0, %c0_i32, %c0_i32_0 : i32, i32, i32
  }
}

</mosaic_0001>

<bundles_post_ra>
// kernel: tpu_custom_call.1
= control target key start
LH: loop header
LB: loop body
LE: loop exit
PB: predicated region body
PF: predicated region fallthrough
CT: control target
= control target key end

     0   :  { %7 = vsyncpa [#allocation4], 0  ;;  %s891_s0 = inlined_call_operand.hbm [shape: f32[2,4,256], index: 0, kind: input, shape index: {}]   ;;  %s892_s1 = inlined_call_operand.hbm [shape: s32[2,1,256], index: 1, kind: input, shape index: {}]   ;;  %s893_s2 = inlined_call_operand.vmem [shape: f32[2,5,128], index: 2, kind: output, shape index: {}]  }
   0x1   :  { %9 = vsyncpa [#allocation4 + $0x1], 0 }
   0x2   :  { %10 = vsyncpa [#allocation6], 0 }
   0x3   :  { %12 = vsyncpa [#allocation6 + $0x1], 0  ;;  %s742_s9 = smov 0   ;;  %s744_s10 = smov 0  }
   0x4   :  { %s746_s11 = smov 0   ;;  %s748_s12 = smov 0  }
   0x5   :  { %s750_s13 = smov 0   ;;  %s752_s14 = smov 0  }
   0x6 LB: > { %s519_s15 = sadd.s32 4294967295, %s721_s14   ;;  %s30_s16 = sadd.s32 1, %s717_s13  ;;  %s721_s14 = sphi %s752_s14, %s18_s14   ;;  %s717_s13 = sphi %s750_s13, %s903_s13   ;;  %s713_s12 = sphi %s748_s12, %s902_s12   ;;  %s709_s11 = sphi %s746_s11, %s901_s11   ;;  %s705_s10 = sphi %s744_s10, %s900_s10   ;;  %s701_s9 = sphi %s742_s9, %s899_s9  }
   0x7   : > { %p32_p0 = scmp.ge.s32.totalorder %s30_s16, 2  ;;  %s39_s17 = sadd.s32 1, %s709_s11 }
   0x8   : > { %p46_p1 = scmp.ne.s32.totalorder %s709_s11, %s705_s10  ;;  %p47_p2 = scmp.eq.s32.totalorder %s721_s14, 0 }
   0x9   : > { %s905_s16 = smov (%p32_p0, %s30_s16), 0  ;;  %p52_p4 = scmp.ne.s32.totalorder %s705_s10, %s701_s9 }
   0xa   : > { %p778_p3 = por %p47_p2, %p46_p1  ;;  %s34_s19 = ssub.s32 %s717_s13, %s905_s16 }
   0xb   : > { %p53_p5 = scmp.eq.s32.totalorder %s519_s15, 0  ;;  %p37_p6 = scmp.eq.s32.totalorder %s34_s19, 0 }
   0xc   : > { %p548_p8 = scmp.lt.s32.totalorder %s721_s14, 2  ;;  %s130_s22 = sand.u32 1, %s709_s11  }
   0xd   : > { %p785_p7 = por %p53_p5, %p52_p4  ;;  %s536_s23 = sshll.u32 %s717_s13, 3 }
   0xe   : > { %s791_s21 = scalar_select %p37_p6, %s709_s11, %s39_s17  }
   0xf   : > { %s523_s24 = sshll.u32 %s130_s22, 3  ;;  %s141_s27 = scalar_lea.hbm %s891_s0, %s536_s23 }
  0x10   : > { %s143_s28 = sshll.u32 %s141_s27, 4  ;;  %s134_s29 = scalar_lea.vmem [#allocation3], %s523_s24  ;;  %s144_s28 = int_to_ptr.hbm [resolvable:$true] %s143_s28 }
  0x11   : > { %s145_s30 = sshll.u32 %s134_s29, 4  ;;  %p800_p9 = pnand %p548_p8, %p778_p3  ;;  %s146_s30 = int_to_ptr.vmem [resolvable:$true] %s145_s30 }
  0x12   : > { %p528_p10 = scmp.ge.s32.totalorder %s721_s14, 1  ;;  %p171_p11 = scmp.lt.s32.totalorder %s721_s14, 3 }
  0x13   : > { %s526_s4 = sshll.u32 %s130_s22, 1  ;;  %s131_s5 = scalar_lea.sflag [#allocation4], %s130_s22 }
  0x14   : > { %544 = dma.hbm_to_vmem [thread:$0]  (!%p800_p9), %s144_s28, 128, %s146_s30, %s131_s5  }
  0x15   : > { %p172_p12 = pnand %p528_p10, %p171_p11  ;;  %s527_s6 = sshll.u32 %s717_s13, 1 }
  0x16   : > { %s156_s7 = scalar_lea.vmem [#allocation5], %s526_s4  ;;  %s162_s17 = scalar_lea.hbm %s892_s1, %s527_s6 }
  0x17   : > { %s166_s8 = sshll.u32 %s156_s7, 4  ;;  %s164_s18 = sshll.u32 %s162_s17, 4  ;;  %s167_s8 = int_to_ptr.vmem [resolvable:$true] %s166_s8  ;;  %s165_s18 = int_to_ptr.hbm [resolvable:$true] %s164_s18 }
  0x18   : > { %s153_s19 = scalar_lea.sflag [#allocation6], %s130_s22  ;;  %175 = sbr.rel (%p172_p12) target bundleno = 247 (0xf7), region = 28 }
  0x19   : > { %547 = dma.hbm_to_vmem [thread:$0]  (!%p800_p9), %s165_s18, 32, %s167_s8, %s153_s19  }
  0x1a   : > { %s177_s23 = sand.u32 (!%p172_p12), 1, %s705_s10  }
  0x1b   : > { %s529_s24 = sshll.u32 (!%p172_p12), %s177_s23, 3  ;;  %s178_s25 = scalar_lea.sflag (!%p172_p12), [#allocation4], %s177_s23 }
  0x1c   : > { %s181_s26 = scalar_lea.vmem (!%p172_p12), [#allocation3], %s529_s24 }
  0x1d   : > { %692 = dma.done.wait (%p785_p7), %s178_s25, 128  }
  0x1e   : > { %694 = vsyncadd (%p785_p7), %s178_s25, 4294967168  ;;  %s530_s27 = sshll.u32 %s177_s23, 1  ;;  %s188_s28 = scalar_lea.sflag [#allocation6], %s177_s23 }
  0x1f   : > { %s819_s29 = scalar_lea.vmem [#allocation5], %s530_s27 }
  0x20   : > { %696 = dma.done.wait (%p785_p7), %s188_s28, 32  }
  0x21   : > { %698 = vsyncadd (%p785_p7), %s188_s28, 4294967264  ;;  %v723_v0 = vmov 0.0   ;;  %v234_v1 = vld [vmem:[%s181_s26] sm:$0xff]  ;;  %vm248_vm0 = vcmask 1043456   ;;  %v232_v25 = vlaneseq  ;;  %v840_v26 = vld [vmem:[%s819_s29] sm:$0x3] }
  0x22   : > { %227 = vst [vmem:[#allocation2] sm:$0x1f] %v723_v0  ;;  %v342_v23 = vrot.slane %v234_v1, 7  ;;  %v298_v32 = vperm.slane %v840_v26, 1  ;;  %v297_v35 = vperm.slane %v840_v26, 0  ;;  %v724_v47 = vmov 1.0  }
  0x23   : > { %228 = vst [vmem:[#allocation2 + $0x8] sm:$0x1f] %v723_v0  ;;  %v233_v29 = vshrl.u32 %v232_v25, 7  ;;  %v349_v48 = vrot.slane %v724_v47, 4  ;;  %v355_v57 = vrot.slane %v724_v47, 7  ;;  %vm326_vm4 = vcmask 1040384  }
  0x24   : > { %243 = vst [vmem:[#allocation1] ss:$2 sm:$0xff] %v234_v1  ;;  %vm344_vm1 = vcmp.gt.f32.partialorder %v234_v1, %v342_v23  ;;  %v725_v60 = vmov 1   ;;  %v354_v63 = vcvt.s32.f32 %v840_v26  ;;  %vm322_vm5 = vcmp.ne.s32.totalorder %v840_v26, 255  ;;  %p219_p13 = scmp.lt.s32.totalorder %s713_s12, 1 }
  0x25   : > { %v837_v24 = vsel %vm344_vm1, 1.0, %v723_v0  ;;  %vm846_vm2 = vcmp.eq.s32.totalorder %v233_v29, %v298_v32  ;;  %vm299_vm3 = vcmp.eq.s32.totalorder %v233_v29, %v297_v35  ;;  %v325_v61 = vrot.slane %v725_v60, 7 }
  0x26   : > { %v350_v62 = vsel %vm248_vm0, 1.0, %v349_v48  ;;  %vm394_vm8 = vcmask 1041408   ;;  %vm397_vm9 = vcmask 1042432   ;;  %vm411_vm10 = vcmask 1044480   ;;  %s907_s12 = smov (!%p219_p13, %s713_s12), 1 }
  0x27   : > { %s531_s20 = sshll.u32 %s907_s12, 3 }
  0x28   : > { %s222_s3 = scalar_lea.vmem %s893_s2, %s531_s20 }
  0x2b   : > { %v244_v2 = vld.sshfl [vmem:[#allocation1] sm:$0xff pattern:$0x75316420]  ;;  %v245_v3 = vld.sshfl [vmem:[#allocation1 + $0x8] sm:$0xff pattern:$0x75316420] }
  0x2c   : > { %v249_v4 = vsel %vm248_vm0, %v244_v2, -inf  ;;  %v256_v5 = vsel %vm248_vm0, %v245_v3, -inf  ;;  %v726_v3 = vmov 286326784  }
  0x2d   : > { %v250_v6 = vrot.slane %v249_v4, 4  ;;  %v257_v7 = vrot.slane %v256_v5, 4 }
  0x2f   : > { %v251_v8 = vmax.f32 %v249_v4, %v250_v6  ;;  %v258_v9 = vmax.f32 %v256_v5, %v257_v7  ;;  %v363_v4 = vunpack.c.l.s4 %v726_v3  ;;  %v356_v5 = vsel %vm326_vm4, 1.0, %v355_v57 }
  0x31   : > { %v252_v10 = vrot.slane %v251_v8, 2  ;;  %v259_v11 = vrot.slane %v258_v9, 2 }
  0x33   : > { %v253_v12 = vmax.f32 %v251_v8, %v252_v10  ;;  %v260_v13 = vmax.f32 %v258_v9, %v259_v11  ;;  %v327_v8 = vsel %vm326_vm4, 1, %v325_v61  ;;  %v351_v9 = vrot.slane %v350_v62, 7 }
  0x34   : > { %vm328_vm6 = vcmp.ne.s32.totalorder %v327_v8, 0 }
  0x35   : > { %v254_v14 = vrot.slane %v253_v12, 1  ;;  %v261_v15 = vrot.slane %v260_v13, 1  ;;  %v353_v23 = vmul.f32 %v837_v24, %v351_v9  ;;  %vm329_vm7 = vmand %vm322_vm5, %vm328_vm6 }
  0x37   : > { %v829_v16 = vmax.f32 %v253_v12, %v254_v14  ;;  %v831_v17 = vmax.f32 %v260_v13, %v261_v15  ;;  %v358_v12 = vmul.f32 %v356_v5, %v354_v63  ;;  %v364_v13 = vunpack.c.0.s8 %v363_v4 }
  0x39   : > { %v265_v18 = vrot.slane %v831_v17, 4  ;;  %v365_v25 = vperm.slane %v358_v12, %v364_v13 }
  0x3b   : > { %v266_v19 = vsel %vm248_vm0, %v829_v16, %v265_v18 }
  0x3c   : > { %v268_v20 = vsub.f32 %v234_v1, %v266_v19 }
  0x3e   : > { %v269_v21 = vmul.f32 1.442695, %v268_v20 }
  0x40   : > { %601 = vpow2.f32 %v269_v21 }
  0x46   : > { %v602_v22 = vpop.eup %601 }
  0x47   : > { %272 = vst [vmem:[#allocation1] ss:$2 sm:$0xff] %v602_v22 }
  0x4e   : > { %v273_v27 = vld.sshfl [vmem:[#allocation1] sm:$0xff pattern:$0x75316420]  ;;  %v274_v28 = vld.sshfl [vmem:[#allocation1 + $0x8] sm:$0xff pattern:$0x75316420] }
  0x4f   : > { %v277_v30 = vsel %vm248_vm0, %v273_v27, 0.0  ;;  %v284_v31 = vsel %vm248_vm0, %v274_v28, 0.0  ;;  %301 = vst [vmem:[#allocation1] ss:$2 sm:$0xff] %v234_v1 }
  0x50   : > { %v278_v33 = vrot.slane %v277_v30, 4  ;;  %v285_v34 = vrot.slane %v284_v31, 4 }
  0x52   : > { %v279_v36 = vadd.f32 %v278_v33, %v277_v30  ;;  %v286_v37 = vadd.f32 %v285_v34, %v284_v31  ;;  %v532_v30 = vsel %vm329_vm7, 1.0, %v723_v0  ;;  %v367_v31 = vmul.f32 %v365_v25, %v353_v23 }
  0x53   : > { %v374_v33 = vperm.slane %v532_v30, 0  ;;  %v375_v34 = vperm.slane %v532_v30, 1 }
  0x54   : > { %v280_v39 = vrot.slane %v279_v36, 2  ;;  %v287_v40 = vrot.slane %v286_v37, 2 }
  0x56   : > { %v281_v41 = vadd.f32 %v280_v39, %v279_v36  ;;  %v288_v42 = vadd.f32 %v287_v40, %v286_v37  ;;  %v302_v43 = vld.sshfl [vmem:[#allocation1] sm:$0xff pattern:$0x75316420]  ;;  %v303_v44 = vld.sshfl [vmem:[#allocation1 + $0x8] sm:$0xff pattern:$0x75316420] }
  0x57   : > { %v306_v45 = vsel %vm299_vm3, %v302_v43, 0.0  ;;  %v307_v46 = vsel %vm846_vm2, %v303_v44, 0.0  ;;  %v379_v36 = vperm.slane %v367_v31, 1  ;;  %v380_v37 = vperm.slane %v367_v31, 5  ;;  %v360_v43 = vld [vmem:[#allocation2 + $0x8] sm:$0x1f] }
  0x58   : > { %v282_v49 = vrot.slane %v281_v41, 1  ;;  %v289_v50 = vrot.slane %v288_v42, 1  ;;  %v308_v51 = vsel %vm248_vm0, %v306_v45, 0.0  ;;  %v315_v52 = vsel %vm248_vm0, %v307_v46, 0.0 }
  0x59   : > { %v309_v53 = vrot.slane %v308_v51, 4  ;;  %v316_v54 = vrot.slane %v315_v52, 4  ;;  %v385_v39 = vperm.slane %v353_v23, 5  ;;  %v389_v40 = vperm.slane %v358_v12, 1 }
  0x5a   : > { %v283_v55 = vadd.f32 %v282_v49, %v281_v41  ;;  %v290_v56 = vadd.f32 %v289_v50, %v288_v42  ;;  %v359_v42 = vld [vmem:[#allocation2] sm:$0x1f] }
  0x5b   : > { %v310_v58 = vadd.f32 %v309_v53, %v308_v51  ;;  %v317_v59 = vadd.f32 %v316_v54, %v315_v52 }
  0x5c   : > { %603 = vlog2.f32 %v283_v55 }
  0x5d   : > { %605 = vlog2.f32 %v290_v56  ;;  %v311_v1 = vrot.slane %v310_v58, 2  ;;  %v318_v2 = vrot.slane %v317_v59, 2 }
  0x5f   : > { %v312_v6 = vadd.f32 %v311_v1, %v310_v58  ;;  %v319_v7 = vadd.f32 %v318_v2, %v317_v59 }
  0x61   : > { %v313_v10 = vrot.slane %v312_v6, 1  ;;  %v320_v11 = vrot.slane %v319_v7, 1 }
  0x62   : > { %v604_v14 = vpop.eup %603 }
  0x63   : > { %v606_v15 = vpop.eup %605  ;;  %v292_v18 = vmul.f32 0.6931472, %v604_v14  ;;  %v314_v20 = vadd.f32 %v313_v10, %v312_v6  ;;  %v321_v21 = vadd.f32 %v320_v11, %v319_v7 }
  0x64   : > { %v294_v19 = vmul.f32 0.6931472, %v606_v15 }
  0x65   : > { %v295_v22 = vadd.f32 %v292_v18, %v829_v16  ;;  %v384_v16 = vperm.slane %v353_v23, 1 }
  0x66   : > { %v296_v27 = vadd.f32 %v294_v19, %v831_v17  ;;  %v388_v17 = vperm.slane %v358_v12, 0 }
  0x67   : > { %v330_v28 = vsub.f32 %v295_v22, %v314_v20 }
  0x68   : > { %v331_v29 = vsub.f32 %v296_v27, %v321_v21 }
  0x6a   : > { %v334_v32 = vrot.slane %v331_v29, 7 }
  0x6c   : > { %v335_v26 = vsel %vm326_vm4, %v330_v28, %v334_v32 }
  0x6d   : > { %v337_v35 = vsel %vm329_vm7, %v335_v26, 0.0 }
  0x6e   : > { %v369_v38 = vperm.slane %v337_v35, 0  ;;  %v370_v24 = vperm.slane %v337_v35, 1 }
  0x70   : > { %v392_v41 = vsel %vm326_vm4, %v369_v38, %v374_v33  ;;  %v393_v0 = vsel %vm326_vm4, %v370_v24, %v375_v34 }
  0x71   : > { %v395_v44 = vsel %vm394_vm8, %v392_v41, %v379_v36  ;;  %v396_v45 = vsel %vm394_vm8, %v393_v0, %v380_v37 }
  0x72   : > { %v398_v46 = vsel %vm397_vm9, %v395_v44, %v384_v16  ;;  %v399_v47 = vsel %vm397_vm9, %v396_v45, %v385_v39 }
  0x73   : > { %v400_v48 = vsel %vm248_vm0, %v398_v46, %v388_v17  ;;  %v401_v49 = vsel %vm248_vm0, %v399_v47, %v389_v40 }
  0x74   : > { %v402_v50 = vadd.f32 %v400_v48, %v359_v42  ;;  %v403_v51 = vadd.f32 %v401_v49, %v360_v43 }
  0x76   : > { %404 = vst [vmem:[#allocation2] sm:$0x1f] %v402_v50 }
  0x77   : > { %405 = vst [vmem:[#allocation2 + $0x8] sm:$0x1f] %v403_v51 }
  0x7d   : > { %v409_v52 = vld [vmem:[#allocation2] sm:$0x1f] }
  0x7e   : > { %v410_v53 = vld [vmem:[#allocation2 + $0x8] sm:$0x1f]  ;;  %v412_v54 = vsel %vm411_vm10, %v409_v52, 0.0 }
  0x7f   : > { %v413_v55 = vsel %vm411_vm10, %v410_v53, 0.0 }
  0x80   : > { %v414_v56 = vadd.f32 %v413_v55, %v412_v54 }
  0x82   : > { %415 = vadd.xlane.f32.xlu0 %v414_v56 }
  0xf5   : > { %v416_v57 = vpop.xlane.xlu0 %415 }
  0xf6   : > { %417 = vst [vmem:[%s222_s3] sm:$0x1f] %v416_v57 }
  0xf7 PF: > { %s18_s14 = sadd.s32 1, %s721_s14   ;;  %s899_s9 = smov %s705_s10 }
  0xf8   : > { %p15_p0 = scmp.ge.s32.totalorder %s18_s14, 4   ;;  %s900_s10 = smov %s709_s11 }
  0xf9   : > { %s901_s11 = smov %s791_s21  ;;  %s902_s12 = smov %s717_s13 }
  0xfa   : > { %s903_s13 = smov %s905_s16  ;;  %17 = sbr.rel (!%p15_p0) target bundleno = 6 (0x6), region = 89 }
  0xff   :  { %437 = vsyncpa [#allocation4], 1 }
 0x100   :  { %439 = vsyncpa [#allocation4 + $0x1], 1 }
 0x101   :  { %440 = vsyncpa [#allocation6], 1 }
 0x102   :  { %442 = vsyncpa [#allocation6 + $0x1], 1 }

</bundles_post_ra>
